<compile_context>
chip_gen: v6e
topology: v6e:2x2x1
jax: 0.10.0
libtpu: 0.0.40
codegen_flags: <defaults>
</compile_context>

<pallas_src>
import numpy as np
import jax
import jax.numpy as jnp
from jax.experimental import pallas as pl
from jax.experimental.pallas import tpu as pltpu


LANE = 128  # lane width (last-dim tiling unit)


def _round_up(x, m):
    return ((x + m - 1) // m) * m


def make_actor_kernel(S, H, A):
    """Build a VPU-only kernel for a fixed (S -> H -> A) MLP.

    Kernel refs:
      params_ref : SMEM (H*S + H + A*H + A,) f32, packed as
                   [W1 (H,S) row-major, b1 (H,), W2 (A,H) row-major, b2 (A,)]
      x_ref      : VMEM (S, TB) f32   -- batch on the lane axis
      o_ref      : VMEM (A, TB) f32   -- lane-dense output
    """
    nw1 = H * S
    nb1 = H
    nw2 = A * H

    def kernel(params_ref, x_ref, o_ref):
        # S slabs of shape (1, TB); static slices of the ref are free views.
        xs = [x_ref[k:k + 1, :] for k in range(S)]

        # Hidden layer: h_j = relu(sum_k W1[j,k] * x_k + b1[j])
        hs = []
        for j in range(H):
            acc = params_ref[j * S + 0] * xs[0]
            for k in range(1, S):
                acc = acc + params_ref[j * S + k] * xs[k]
            acc = acc + params_ref[nw1 + j]
            hs.append(jnp.maximum(acc, 0.0))

        # Output layer: y_a = tanh(sum_j W2[a,j] * h_j + b2[a])
        for a in range(A):
            acc = params_ref[nw1 + nb1 + a * H + 0] * hs[0]
            for j in range(1, H):
                acc = acc + params_ref[nw1 + nb1 + a * H + j] * hs[j]
            acc = acc + params_ref[nw1 + nb1 + nw2 + a]
            o_ref[a:a + 1, :] = jnp.tanh(acc)

    return kernel


def pack_actor_params(w1, b1, w2, b2):
    """Pack PyTorch-layout params (W1:(H,S), b1:(H,), W2:(A,H), b2:(A,)) into
    one flat f32 array for SMEM. Call once, reuse across forward calls."""
    return jnp.concatenate(
        [jnp.ravel(w1), jnp.ravel(b1), jnp.ravel(w2), jnp.ravel(b2)]
    ).astype(jnp.float32)


def actor_forward(state, params, *, state_size=2, fc1_units=2, action_size=1,
                  block_b=512):
    """state: [B, S] -> [B, A].  `params` is the flat array from pack_actor_params."""
    B, S_in = state.shape
    S, H, A = state_size, fc1_units, action_size
    assert S_in == S
    nparams = H * S + H + A * H + A
    assert params.shape == (nparams,)

    # Batch on the lane axis; no padding materialized (Pallas handles the
    # ragged last block). The transpose moves only B*S f32 (tiny).
    x_t = state.astype(jnp.float32).T  # (S, B)

    if B <= LANE:
        TB = B                                   # single full-array block
    else:
        # >= 2 grid steps so v7x's two TensorCores both get work; TB is a
        # multiple of 128 so full blocks store with unmasked, lane-dense vst.
        half = _round_up((B + 1) // 2, LANE)
        TB = min(_round_up(block_b, LANE), half)
    grid = (pl.cdiv(B, TB),)

    # Real (unpadded) work for XLA's scheduler.
    cost = pl.CostEstimate(
        flops=2 * B * S * H + 2 * B * H * A + 2 * B * (H + A),
        transcendentals=B * A,
        bytes_accessed=4 * (B * S + B * A + nparams),
    )

    out_t = pl.pallas_call(
        make_actor_kernel(S, H, A),
        out_shape=jax.ShapeDtypeStruct((A, B), jnp.float32),
        grid=grid,
        in_specs=[
            pl.BlockSpec(memory_space=pltpu.MemorySpace.SMEM),  # packed scalars
            pl.BlockSpec((S, TB), lambda i: (0, i)),            # state^T, lane-tiled batch
        ],
        out_specs=pl.BlockSpec((A, TB), lambda i: (0, i)),
        compiler_params=pltpu.CompilerParams(
            dimension_semantics=("parallel",),   # shard batch across TCs (v7x)
            vmem_limit_bytes=4 * 1024 * 1024,    # tight budget; footprint is tiny
        ),
        cost_estimate=cost,
    )(params, x_t)

    return out_t.T  # (B, A)


def init_actor_params(key, state_size=2, fc1_units=2, action_size=1):
    """Deterministic init mirroring PyTorch nn.Linear default:
    U(-1/sqrt(fan_in), 1/sqrt(fan_in)). Weights kept in torch layout (out, in)."""
    k1, k2, k3, k4 = jax.random.split(key, 4)
    lim1 = 1.0 / np.sqrt(state_size)
    lim2 = 1.0 / np.sqrt(fc1_units)
    w1 = jax.random.uniform(k1, (fc1_units, state_size), jnp.float32, -lim1, lim1)
    b1 = jax.random.uniform(k2, (fc1_units,), jnp.float32, -lim1, lim1)
    w2 = jax.random.uniform(k3, (action_size, fc1_units), jnp.float32, -lim2, lim2)
    b2 = jax.random.uniform(k4, (action_size,), jnp.float32, -lim2, lim2)
    return w1, b1, w2, b2


def _reference(state, w1, b1, w2, b2):
    h = jnp.maximum(state @ w1.T + b1, 0.0)
    return jnp.tanh(h @ w2.T + b2)


if __name__ == "__main__":
    key = jax.random.PRNGKey(0)
    k_params, k_state1, k_state2 = jax.random.split(key, 3)

    state_size, fc1_units, action_size = 2, 2, 1
    w1, b1, w2, b2 = init_actor_params(
        k_params, state_size=state_size, fc1_units=fc1_units, action_size=action_size
    )
    params = pack_actor_params(w1, b1, w2, b2)   # packed once, reused

    # Small shape consistent with the module (single block, B <= 128).
    state = jax.random.normal(k_state1, (8, state_size), jnp.float32)
    out = jax.block_until_ready(
        actor_forward(state, params, state_size=state_size,
                      fc1_units=fc1_units, action_size=action_size)
    )
    ref = _reference(state, w1, b1, w2, b2)
    np.testing.assert_allclose(np.asarray(out), np.asarray(ref), rtol=1e-5, atol=1e-5)

    # Larger, non-divisible batch: exercises multi-step grid + ragged last block.
    state2 = jax.random.normal(k_state2, (260, state_size), jnp.float32)
    out2 = jax.block_until_ready(
        actor_forward(state2, params, state_size=state_size,
                      fc1_units=fc1_units, action_size=action_size, block_b=128)
    )
    ref2 = _reference(state2, w1, b1, w2, b2)
    np.testing.assert_allclose(np.asarray(out2), np.asarray(ref2), rtol=1e-5, atol=1e-5)

    print("KERNEL_OK")
</pallas_src>

<mosaic_0001>
module attributes {stable_mosaic.version = 11 : i64} {
  func.func @kernel(%arg0: i32, %arg1: memref<9xf32, #tpu.memory_space<smem>>, %arg2: memref<2x8xf32, #tpu.memory_space<vmem>>, %arg3: memref<1x8xf32, #tpu.memory_space<vmem>>) attributes {dimension_semantics = [#tpu.dimension_semantics<parallel>], iteration_bounds = array<i64: 1>, scalar_prefetch = 0 : i64, scratch_operands = 0 : i64, tpu.core_type = #tpu.core_type<tc>, window_params = [{transform_indices = @transform_0, window_bounds = array<i64: 9>}, {transform_indices = @transform_1, window_bounds = array<i64: 2, 8>}, {transform_indices = @transform_2, window_bounds = array<i64: 1, 8>}]} {
    %c0 = arith.constant 0 : index
    %c0_0 = arith.constant 0 : index
    %0 = vector.load %arg2[%c0, %c0_0] : memref<2x8xf32, #tpu.memory_space<vmem>>, vector<1x8xf32>
    %c1 = arith.constant 1 : index
    %c0_1 = arith.constant 0 : index
    %1 = vector.load %arg2[%c1, %c0_1] : memref<2x8xf32, #tpu.memory_space<vmem>>, vector<1x8xf32>
    %c0_2 = arith.constant 0 : index
    %2 = memref.load %arg1[%c0_2] : memref<9xf32, #tpu.memory_space<smem>>
    %3 = vector.broadcast %2 : f32 to vector<1x8xf32>
    %4 = arith.mulf %3, %0 : vector<1x8xf32>
    %c1_3 = arith.constant 1 : index
    %5 = memref.load %arg1[%c1_3] : memref<9xf32, #tpu.memory_space<smem>>
    %6 = vector.broadcast %5 : f32 to vector<1x8xf32>
    %7 = arith.mulf %6, %1 : vector<1x8xf32>
    %8 = arith.addf %4, %7 : vector<1x8xf32>
    %c4 = arith.constant 4 : index
    %9 = memref.load %arg1[%c4] : memref<9xf32, #tpu.memory_space<smem>>
    %10 = vector.broadcast %9 : f32 to vector<1x8xf32>
    %11 = arith.addf %8, %10 : vector<1x8xf32>
    %cst = arith.constant 0.000000e+00 : f32
    %12 = vector.broadcast %cst : f32 to vector<1x8xf32>
    %13 = arith.maximumf %11, %12 : vector<1x8xf32>
    %c2 = arith.constant 2 : index
    %14 = memref.load %arg1[%c2] : memref<9xf32, #tpu.memory_space<smem>>
    %15 = vector.broadcast %14 : f32 to vector<1x8xf32>
    %16 = arith.mulf %15, %0 : vector<1x8xf32>
    %c3 = arith.constant 3 : index
    %17 = memref.load %arg1[%c3] : memref<9xf32, #tpu.memory_space<smem>>
    %18 = vector.broadcast %17 : f32 to vector<1x8xf32>
    %19 = arith.mulf %18, %1 : vector<1x8xf32>
    %20 = arith.addf %16, %19 : vector<1x8xf32>
    %c5 = arith.constant 5 : index
    %21 = memref.load %arg1[%c5] : memref<9xf32, #tpu.memory_space<smem>>
    %22 = vector.broadcast %21 : f32 to vector<1x8xf32>
    %23 = arith.addf %20, %22 : vector<1x8xf32>
    %cst_4 = arith.constant 0.000000e+00 : f32
    %24 = vector.broadcast %cst_4 : f32 to vector<1x8xf32>
    %25 = arith.maximumf %23, %24 : vector<1x8xf32>
    %c6 = arith.constant 6 : index
    %26 = memref.load %arg1[%c6] : memref<9xf32, #tpu.memory_space<smem>>
    %27 = vector.broadcast %26 : f32 to vector<1x8xf32>
    %28 = arith.mulf %27, %13 : vector<1x8xf32>
    %c7 = arith.constant 7 : index
    %29 = memref.load %arg1[%c7] : memref<9xf32, #tpu.memory_space<smem>>
    %30 = vector.broadcast %29 : f32 to vector<1x8xf32>
    %31 = arith.mulf %30, %25 : vector<1x8xf32>
    %32 = arith.addf %28, %31 : vector<1x8xf32>
    %c8 = arith.constant 8 : index
    %33 = memref.load %arg1[%c8] : memref<9xf32, #tpu.memory_space<smem>>
    %34 = vector.broadcast %33 : f32 to vector<1x8xf32>
    %35 = arith.addf %32, %34 : vector<1x8xf32>
    %36 = math.tanh %35 : vector<1x8xf32>
    %c0_5 = arith.constant 0 : index
    %c0_6 = arith.constant 0 : index
    %37 = vector.load %arg3[%c0_5, %c0_6] : memref<1x8xf32, #tpu.memory_space<vmem>>, vector<1x8xf32>
    tpu.vector_store %arg3[%c0_5, %c0_6], %36 {strides = array<i32>} : memref<1x8xf32, #tpu.memory_space<vmem>>, vector<1x8xf32>,
    return
  }
  func.func @transform_0(%arg0: i32) -> i32 {
    %c0_i32 = arith.constant 0 : i32
    %c0_i32_0 = arith.constant 0 : i32
    return %c0_i32 : i32
  }
  func.func @transform_1(%arg0: i32) -> (i32, i32) {
    %c0_i32 = arith.constant 0 : i32
    %c0_i32_0 = arith.constant 0 : i32
    return %c0_i32, %arg0 : i32, i32
  }
  func.func @transform_2(%arg0: i32) -> (i32, i32) {
    %c0_i32 = arith.constant 0 : i32
    %c0_i32_0 = arith.constant 0 : i32
    return %c0_i32, %arg0 : i32, i32
  }
}

</mosaic_0001>

<bundles_post_ra>
// kernel: tpu_custom_call.1
= control target key start
LH: loop header
LB: loop body
LE: loop exit
PB: predicated region body
PF: predicated region fallthrough
CT: control target
= control target key end

     0   :  { %7 = vsyncpa [#allocation5], 0  ;;  %s182_s0 = inlined_call_operand.hbm [shape: f32[9], index: 0, kind: input, shape index: {}]   ;;  %s183_s1 = inlined_call_operand.hbm [shape: f32[2,8], index: 1, kind: input, shape index: {}]   ;;  %s184_s2 = inlined_call_operand.hbm [shape: f32[1,8], index: 2, kind: output, shape index: {}]  }
   0x1   :  { %8 = vsyncpa [#allocation3], 0 }
   0x2   :  { %9 = vsyncpa [#allocation4], 0  ;;  %s155_s9 = smov [#allocation2]   ;;  %s156_s12 = smov [#allocation6]  }
   0x3   :  { %17 = dma.hbm_to_smem %s182_s0, 16, %s155_s9, [#allocation5]  }
   0x4   :  { %s24_s13 = sshll.u32 %s156_s12, 4  ;;  %s25_s13 = int_to_ptr.vmem [resolvable:$true] %s24_s13 }
   0x5   :  { %s117_s14 = scalar_lea.vmem %s25_s13, 32  ;;  %p122_p1 = scmp.lt.s32.totalorder %s25_s13, %s25_s13 }
   0x6   :  { %p118_p0 = scmp.ne.s32.totalorder %s25_s13, %s117_s14  ;;  %p123_p2 = scmp.lt.s32.totalorder %s117_s14, %s117_s14 }
   0x8   :  { %p124_p3 = por %p123_p2, %p122_p1 }
   0xa   :  { %p125_p4 = pnand %p124_p3, %p118_p0 }
   0xc   :  { %128 = shalt.err (!%p125_p4)
}
   0xd   :  { %27 = dma.hbm_to_vmem [thread:$0]  %s183_s1, 32, %s25_s13, [#allocation3]  }
   0xe   :  { %149 = dma.done.wait [#allocation5], 16  }
   0xf   :  { %150 = vsyncadd [#allocation5], 4294967280 }
  0x10   :  { %151 = dma.done.wait [#allocation3], 32  }
  0x11   :  { %152 = vsyncadd [#allocation3], 4294967264 }
  0x12   :  { %34 = sfence }
  0x13   :  { %s37_s0 = sld [smem:[#allocation2]]  ;;  %v35_v0 = vld [vmem:[#allocation6] sm:$0x1]  ;;  %v36_v1 = vld [vmem:[#allocation6 + $0x1] sm:$0x1]  ;;  %s157_s24 = smov [#allocation7]  }
  0x14   :  { %s88_s17 = sld [smem:[#allocation2 + $0x1]]  ;;  %s78_s25 = sshll.u32 %s157_s24, 4  ;;  %vm70_vm0 = vcmask 57344   ;;  %s79_s25 = int_to_ptr.vmem [resolvable:$true] %s78_s25 }
  0x15   :  { %s89_s18 = sld [smem:[#allocation2 + $0x4]]  ;;  %s129_s26 = scalar_lea.vmem %s79_s25, 16 }
  0x16   :  { %s90_s19 = sld [smem:[#allocation2 + $0x2]]  ;;  %p130_p5 = scmp.ne.s32.totalorder %s79_s25, %s129_s26 }
  0x17   :  { %s91_s20 = sld [smem:[#allocation2 + $0x3]]  ;;  %s133_s27 = scalar_lea.vmem %s79_s25, 32 }
  0x18   :  { %s92_s21 = sld [smem:[#allocation2 + $0x5]]  ;;  %p134_p6 = scmp.lt.s32.totalorder %s79_s25, %s79_s25 }
  0x19   :  { %v38_v2 = vstv %s37_s0  ;;  %s93_s22 = sld [smem:[#allocation2 + $0x6]]  ;;  %p135_p7 = scmp.lt.s32.totalorder %s133_s27, %s129_s26 }
  0x1a   :  { %v39_v3 = vmul.f32 %v38_v2, %v35_v0  ;;  %v41_v4 = vstv %s88_s17  ;;  %s94_s23 = sld [smem:[#allocation2 + $0x7]] }
  0x1b   :  { %v42_v5 = vmul.f32 %v41_v4, %v36_v1  ;;  %v45_v6 = vstv %s89_s18  ;;  %s95_s1 = sld [smem:[#allocation2 + $0x8]]  ;;  %p136_p8 = por %p135_p7, %p134_p6 }
  0x1c   :  { %v49_v7 = vstv %s90_s19 }
  0x1d   :  { %v43_v8 = vadd.f32 %v42_v5, %v39_v3  ;;  %v50_v9 = vmul.f32 %v49_v7, %v35_v0  ;;  %v52_v10 = vstv %s91_s20  ;;  %p137_p9 = pnand %p136_p8, %p130_p5 }
  0x1e   :  { %v53_v11 = vmul.f32 %v52_v10, %v36_v1  ;;  %v56_v13 = vstv %s92_s21 }
  0x1f   :  { %v46_v12 = vadd.f32 %v45_v6, %v43_v8  ;;  %v60_v16 = vstv %s93_s22 }
  0x20   :  { %v54_v14 = vadd.f32 %v53_v11, %v50_v9  ;;  %v63_v18 = vstv %s94_s23 }
  0x21   :  { %v47_v15 = vmax.f32 %v46_v12, 0.0  ;;  %v67_v22 = vstv %s95_s1 }
  0x22   :  { %v57_v17 = vadd.f32 %v56_v13, %v54_v14 }
  0x23   :  { %v61_v20 = vmul.f32 %v60_v16, %v47_v15 }
  0x24   :  { %v58_v19 = vmax.f32 %v57_v17, 0.0 }
  0x26   :  { %v64_v21 = vmul.f32 %v63_v18, %v58_v19 }
  0x28   :  { %v65_v23 = vadd.f32 %v64_v21, %v61_v20 }
  0x2a   :  { %v68_v24 = vadd.f32 %v67_v22, %v65_v23 }
  0x2c   :  { %99 = vtanh.f32 %v68_v24 }
  0x39   :  { %v100_v25 = vpop.eup %99 }
  0x3a   :  { %71 = vst.msk [vmem:[#allocation7] sm:$0x1] %vm70_vm0, %v100_v25 }
  0x3b   :  { %140 = shalt.err (!%p137_p9)
}
  0x3c   :  { %81 = dma.vmem_to_hbm [thread:$0]  %s79_s25, 16, %s184_s2, [#allocation4]  }
  0x3d   :  { %153 = dma.done.wait [#allocation4], 16  }
  0x3e   :  { %154 = vsyncadd [#allocation4], 4294967280 }
  0x3f   :  { %85 = vsyncpa [#allocation3], 1 }
  0x40   :  { %86 = vsyncpa [#allocation4], 1 }
  0x41   :  { %87 = vsyncpa [#allocation5], 1 }

</bundles_post_ra>
